<compile_context>
chip_gen: v7x
topology: tpu7x:2x2x1
jax: 0.10.0
libtpu: 0.0.40
codegen_flags: <defaults>
</compile_context>

<pallas_src>
import numpy as np
import jax
import jax.numpy as jnp
from jax import lax
from jax.experimental import pallas as pl
from jax.experimental.pallas import tpu as pltpu

# Small, module-consistent shapes: batch=2, planes=8, spatial=16x16.
N, C, H, W = 2, 8, 16, 16
NHW = N * H * W
EPS = 1e-5


def base_block_kernel(x_ref, m_ref, w1_ref, g1_ref, be1_ref,
                      w2_ref, g2_ref, be2_ref, o_ref, tap_ref):
    xf = x_ref[...]                                    # (C, NHW) f32, lane-dense

    def conv3x3(inp, w_ref):
        # im2col into the VMEM scratch, one dy-group (3 taps) at a time, with an
        # accumulating (C,3C)@(3C,NHW) MXU dot per group.  Each tap is one XLU
        # lane-rotate of a 4-vreg slab, zeroed at image borders by the
        # precomputed mask row.
        acc = None
        for dy in range(3):
            for dx in range(3):
                k = dy * 3 + dx
                off = (dy - 1) * W + (dx - 1)          # tap[p] = inp[p + off]
                if off == 0:                           # center tap: no roll, mask all-ones
                    tap = inp
                else:
                    tap = pltpu.roll(inp, (-off) % NHW, 1) * m_ref[pl.ds(k, 1), :]
                tap_ref[pl.ds(k * C, C), :] = tap
            part = jnp.dot(w_ref[dy],                                  # (C, 3C)
                           tap_ref[pl.ds(dy * 3 * C, 3 * C), :],       # (3C, NHW)
                           preferred_element_type=jnp.float32)
            acc = part if acc is None else acc + part
        return acc                                     # (C, NHW) f32

    def batchnorm(y, g_ref, be_ref):
        # train-mode BN: per-channel batch stats over the lane (N*H*W) axis,
        # biased variance computed on centered values (numerically safe).
        mean = jnp.mean(y, axis=1, keepdims=True)        # (C, 1)
        yc = y - mean
        var = jnp.mean(yc * yc, axis=1, keepdims=True)   # (C, 1)
        return yc * lax.rsqrt(var + EPS) * g_ref[...] + be_ref[...]

    h = jnp.maximum(batchnorm(conv3x3(xf, w1_ref), g1_ref, be1_ref), 0.0)
    out = batchnorm(conv3x3(h, w2_ref), g2_ref, be2_ref)
    out = jnp.maximum(out + xf, 0.0)                     # residual add + ReLU
    o_ref[...] = out.astype(o_ref.dtype)                 # (8, 512): unmasked lane-dense store


def make_masks():
    # (9, NHW) f32: row k = 1.0 where tap (dy,dx)=(k//3,k%3) is inside the image.
    p = np.arange(NHW)
    ii = (p // W) % H
    jj = p % W
    rows = []
    for dy in range(3):
        for dx in range(3):
            si = ii + (dy - 1)
            sj = jj + (dx - 1)
            ok = (si >= 0) & (si < H) & (sj >= 0) & (sj < W)
            rows.append(ok.astype(np.float32))
    return jnp.asarray(np.stack(rows, axis=0))


def prepare_params(params):
    """One-time packing (hoisted out of the per-call path)."""
    w1, b1, g1, be1, w2, b2, g2, be2 = params
    del b1, b2  # conv bias is exactly cancelled by train-mode BN mean subtraction

    def pack_w(w):
        # (Cout, Cin, 3, 3) -> (3, Cout, 3*Cin): group dy, column = dx*Cin + cin
        return jnp.transpose(w, (2, 0, 3, 1)).reshape(3, C, 3 * C).astype(jnp.float32)

    col = lambda v: v.reshape(C, 1).astype(jnp.float32)
    return (make_masks(),
            pack_w(w1), col(g1), col(be1),
            pack_w(w2), col(g2), col(be2))


def base_block(x_nchw, prepared):
    """x_nchw: (N, C, H, W) float32; prepared: output of prepare_params."""
    # NCHW -> (C, N*H*W) lane-dense slab (layout plumbing stays in XLA).
    # TODO(synk): accept activations already in (C, NHW) layout to drop this
    # per-call transpose round-trip when the caller allows it.
    x_t = jnp.transpose(x_nchw, (1, 0, 2, 3)).reshape(C, NHW).astype(jnp.float32)

    args = (x_t,) + tuple(prepared)
    vmem = pl.BlockSpec(memory_space=pltpu.MemorySpace.VMEM)
    out_t = pl.pallas_call(
        base_block_kernel,
        out_shape=jax.ShapeDtypeStruct((C, NHW), jnp.float32),
        in_specs=[vmem] * len(args),
        out_specs=vmem,
        scratch_shapes=[pltpu.VMEM((9 * C, NHW), jnp.float32)],  # im2col tap slab
    )(*args)

    # (C, N*H*W) -> NCHW
    return jnp.transpose(out_t.reshape(C, N, H, W), (1, 0, 2, 3))


def base_block_reference(x, params):
    """Pure-JAX reference matching PyTorch baseBlock.forward (train-mode BN, conv bias)."""
    w1, b1, g1, be1, w2, b2, g2, be2 = params

    def conv(x, w, b):
        y = lax.conv_general_dilated(x, w, (1, 1), ((1, 1), (1, 1)),
                                     dimension_numbers=('NCHW', 'OIHW', 'NCHW'))
        return y + b[None, :, None, None]

    def bn(y, g, be):
        mean = jnp.mean(y, axis=(0, 2, 3), keepdims=True)
        var = jnp.mean((y - mean) ** 2, axis=(0, 2, 3), keepdims=True)
        return ((y - mean) / jnp.sqrt(var + EPS)) * g[None, :, None, None] \
            + be[None, :, None, None]

    h = jax.nn.relu(bn(conv(x, w1, b1), g1, be1))
    out = bn(conv(h, w2, b2), g2, be2) + x
    return jax.nn.relu(out)


if __name__ == "__main__":
    key = jax.random.PRNGKey(0)
    ks = jax.random.split(key, 9)

    x = jax.random.normal(ks[0], (N, C, H, W), jnp.float32)

    # Deterministic synthetic parameters (PyTorch shapes: conv (Cout,Cin,3,3), BN (C,)).
    w1 = 0.1 * jax.random.normal(ks[1], (C, C, 3, 3), jnp.float32)
    b1 = 0.1 * jax.random.normal(ks[2], (C,), jnp.float32)
    g1 = 1.0 + 0.1 * jax.random.normal(ks[3], (C,), jnp.float32)
    be1 = 0.05 * jax.random.normal(ks[4], (C,), jnp.float32)
    w2 = 0.1 * jax.random.normal(ks[5], (C, C, 3, 3), jnp.float32)
    b2 = 0.1 * jax.random.normal(ks[6], (C,), jnp.float32)
    g2 = 1.0 + 0.1 * jax.random.normal(ks[7], (C,), jnp.float32)
    be2 = 0.05 * jax.random.normal(ks[8], (C,), jnp.float32)

    params = (w1, b1, g1, be1, w2, b2, g2, be2)
    prepared = prepare_params(params)

    out = jax.block_until_ready(base_block(x, prepared))
    ref = jax.block_until_ready(base_block_reference(x, params))

    assert out.shape == (N, C, H, W)
    assert jnp.allclose(out, ref, atol=1e-4, rtol=1e-4), \
        f"max abs err = {jnp.max(jnp.abs(out - ref))}"
    print("KERNEL_OK")
</pallas_src>

<mosaic_0001>
module attributes {stable_mosaic.version = 11 : i64} {
  func.func @base_block_kernel(%arg0: memref<8x512xf32, #tpu.memory_space<vmem>>, %arg1: memref<9x512xf32, #tpu.memory_space<vmem>>, %arg2: memref<3x8x24xf32, #tpu.memory_space<vmem>>, %arg3: memref<8x1xf32, #tpu.memory_space<vmem>>, %arg4: memref<8x1xf32, #tpu.memory_space<vmem>>, %arg5: memref<3x8x24xf32, #tpu.memory_space<vmem>>, %arg6: memref<8x1xf32, #tpu.memory_space<vmem>>, %arg7: memref<8x1xf32, #tpu.memory_space<vmem>>, %arg8: memref<8x512xf32, #tpu.memory_space<vmem>>, %arg9: memref<72x512xf32, #tpu.memory_space<vmem>>) attributes {dimension_semantics = [], scalar_prefetch = 0 : i64, scratch_operands = 1 : i64, tpu.core_type = #tpu.core_type<tc>} {
    %c0 = arith.constant 0 : index
    %c0_0 = arith.constant 0 : index
    %0 = vector.load %arg0[%c0, %c0_0] : memref<8x512xf32, #tpu.memory_space<vmem>>, vector<8x512xf32>
    %c17_i32 = arith.constant 17 : i32
    %1 = tpu.dynamic_rotate %0 by %c17_i32 dim 1 : vector<8x512xf32>, i32 -> vector<8x512xf32>
    %c0_1 = arith.constant 0 : index
    %c0_2 = arith.constant 0 : index
    %2 = vector.load %arg1[%c0_1, %c0_2] : memref<9x512xf32, #tpu.memory_space<vmem>>, vector<1x512xf32>
    %3 = vector.broadcast %2 : vector<1x512xf32> to vector<8x512xf32>
    %4 = arith.mulf %1, %3 : vector<8x512xf32>
    %c0_3 = arith.constant 0 : index
    %c0_4 = arith.constant 0 : index
    %5 = vector.load %arg9[%c0_3, %c0_4] : memref<72x512xf32, #tpu.memory_space<vmem>>, vector<8x512xf32>
    tpu.vector_store %arg9[%c0_3, %c0_4], %4 {strides = array<i32>} : memref<72x512xf32, #tpu.memory_space<vmem>>, vector<8x512xf32>,
    %c16_i32 = arith.constant 16 : i32
    %6 = tpu.dynamic_rotate %0 by %c16_i32 dim 1 : vector<8x512xf32>, i32 -> vector<8x512xf32>
    %c1 = arith.constant 1 : index
    %c0_5 = arith.constant 0 : index
    %7 = vector.load %arg1[%c1, %c0_5] : memref<9x512xf32, #tpu.memory_space<vmem>>, vector<1x512xf32>
    %8 = vector.broadcast %7 : vector<1x512xf32> to vector<8x512xf32>
    %9 = arith.mulf %6, %8 : vector<8x512xf32>
    %c8 = arith.constant 8 : index
    %c0_6 = arith.constant 0 : index
    %10 = vector.load %arg9[%c8, %c0_6] : memref<72x512xf32, #tpu.memory_space<vmem>>, vector<8x512xf32>
    tpu.vector_store %arg9[%c8, %c0_6], %9 {strides = array<i32>} : memref<72x512xf32, #tpu.memory_space<vmem>>, vector<8x512xf32>,
    %c15_i32 = arith.constant 15 : i32
    %11 = tpu.dynamic_rotate %0 by %c15_i32 dim 1 : vector<8x512xf32>, i32 -> vector<8x512xf32>
    %c2 = arith.constant 2 : index
    %c0_7 = arith.constant 0 : index
    %12 = vector.load %arg1[%c2, %c0_7] : memref<9x512xf32, #tpu.memory_space<vmem>>, vector<1x512xf32>
    %13 = vector.broadcast %12 : vector<1x512xf32> to vector<8x512xf32>
    %14 = arith.mulf %11, %13 : vector<8x512xf32>
    %c16 = arith.constant 16 : index
    %c0_8 = arith.constant 0 : index
    %15 = vector.load %arg9[%c16, %c0_8] : memref<72x512xf32, #tpu.memory_space<vmem>>, vector<8x512xf32>
    tpu.vector_store %arg9[%c16, %c0_8], %14 {strides = array<i32>} : memref<72x512xf32, #tpu.memory_space<vmem>>, vector<8x512xf32>,
    %c0_9 = arith.constant 0 : index
    %c0_10 = arith.constant 0 : index
    %c0_11 = arith.constant 0 : index
    %16 = vector.load %arg2[%c0_9, %c0_10, %c0_11] : memref<3x8x24xf32, #tpu.memory_space<vmem>>, vector<1x8x24xf32>
    %17 = vector.shape_cast %16 : vector<1x8x24xf32> to vector<8x24xf32>
    %c0_12 = arith.constant 0 : index
    %c0_13 = arith.constant 0 : index
    %18 = vector.load %arg9[%c0_12, %c0_13] : memref<72x512xf32, #tpu.memory_space<vmem>>, vector<24x512xf32>
    %cst = arith.constant dense<0.000000e+00> : vector<8x512xf32>
    %19 = tpu.matmul %17, %18, %cst {dimension_numbers = #tpu.dot_dimension_numbers<[1], [0], [0], [1], [0, 0, 1, 1], [], []>} : vector<8x24xf32>, vector<24x512xf32>, vector<8x512xf32> -> vector<8x512xf32>
    %c1_i32 = arith.constant 1 : i32
    %20 = tpu.dynamic_rotate %0 by %c1_i32 dim 1 : vector<8x512xf32>, i32 -> vector<8x512xf32>
    %c3 = arith.constant 3 : index
    %c0_14 = arith.constant 0 : index
    %21 = vector.load %arg1[%c3, %c0_14] : memref<9x512xf32, #tpu.memory_space<vmem>>, vector<1x512xf32>
    %22 = vector.broadcast %21 : vector<1x512xf32> to vector<8x512xf32>
    %23 = arith.mulf %20, %22 : vector<8x512xf32>
    %c24 = arith.constant 24 : index
    %c0_15 = arith.constant 0 : index
    %24 = vector.load %arg9[%c24, %c0_15] : memref<72x512xf32, #tpu.memory_space<vmem>>, vector<8x512xf32>
    tpu.vector_store %arg9[%c24, %c0_15], %23 {strides = array<i32>} : memref<72x512xf32, #tpu.memory_space<vmem>>, vector<8x512xf32>,
    %c32 = arith.constant 32 : index
    %c0_16 = arith.constant 0 : index
    %25 = vector.load %arg9[%c32, %c0_16] : memref<72x512xf32, #tpu.memory_space<vmem>>, vector<8x512xf32>
    tpu.vector_store %arg9[%c32, %c0_16], %0 {strides = array<i32>} : memref<72x512xf32, #tpu.memory_space<vmem>>, vector<8x512xf32>,
    %c511_i32 = arith.constant 511 : i32
    %26 = tpu.dynamic_rotate %0 by %c511_i32 dim 1 : vector<8x512xf32>, i32 -> vector<8x512xf32>
    %c5 = arith.constant 5 : index
    %c0_17 = arith.constant 0 : index
    %27 = vector.load %arg1[%c5, %c0_17] : memref<9x512xf32, #tpu.memory_space<vmem>>, vector<1x512xf32>
    %28 = vector.broadcast %27 : vector<1x512xf32> to vector<8x512xf32>
    %29 = arith.mulf %26, %28 : vector<8x512xf32>
    %c40 = arith.constant 40 : index
    %c0_18 = arith.constant 0 : index
    %30 = vector.load %arg9[%c40, %c0_18] : memref<72x512xf32, #tpu.memory_space<vmem>>, vector<8x512xf32>
    tpu.vector_store %arg9[%c40, %c0_18], %29 {strides = array<i32>} : memref<72x512xf32, #tpu.memory_space<vmem>>, vector<8x512xf32>,
    %c1_19 = arith.constant 1 : index
    %c0_20 = arith.constant 0 : index
    %c0_21 = arith.constant 0 : index
    %31 = vector.load %arg2[%c1_19, %c0_20, %c0_21] : memref<3x8x24xf32, #tpu.memory_space<vmem>>, vector<1x8x24xf32>
    %32 = vector.shape_cast %31 : vector<1x8x24xf32> to vector<8x24xf32>
    %c24_22 = arith.constant 24 : index
    %c0_23 = arith.constant 0 : index
    %33 = vector.load %arg9[%c24_22, %c0_23] : memref<72x512xf32, #tpu.memory_space<vmem>>, vector<24x512xf32>
    %cst_24 = arith.constant dense<0.000000e+00> : vector<8x512xf32>
    %34 = tpu.matmul %32, %33, %cst_24 {dimension_numbers = #tpu.dot_dimension_numbers<[1], [0], [0], [1], [0, 0, 1, 1], [], []>} : vector<8x24xf32>, vector<24x512xf32>, vector<8x512xf32> -> vector<8x512xf32>
    %35 = arith.addf %19, %34 : vector<8x512xf32>
    %c497_i32 = arith.constant 497 : i32
    %36 = tpu.dynamic_rotate %0 by %c497_i32 dim 1 : vector<8x512xf32>, i32 -> vector<8x512xf32>
    %c6 = arith.constant 6 : index
    %c0_25 = arith.constant 0 : index
    %37 = vector.load %arg1[%c6, %c0_25] : memref<9x512xf32, #tpu.memory_space<vmem>>, vector<1x512xf32>
    %38 = vector.broadcast %37 : vector<1x512xf32> to vector<8x512xf32>
    %39 = arith.mulf %36, %38 : vector<8x512xf32>
    %c48 = arith.constant 48 : index
    %c0_26 = arith.constant 0 : index
    %40 = vector.load %arg9[%c48, %c0_26] : memref<72x512xf32, #tpu.memory_space<vmem>>, vector<8x512xf32>
    tpu.vector_store %arg9[%c48, %c0_26], %39 {strides = array<i32>} : memref<72x512xf32, #tpu.memory_space<vmem>>, vector<8x512xf32>,
    %c496_i32 = arith.constant 496 : i32
    %41 = tpu.dynamic_rotate %0 by %c496_i32 dim 1 : vector<8x512xf32>, i32 -> vector<8x512xf32>
    %c7 = arith.constant 7 : index
    %c0_27 = arith.constant 0 : index
    %42 = vector.load %arg1[%c7, %c0_27] : memref<9x512xf32, #tpu.memory_space<vmem>>, vector<1x512xf32>
    %43 = vector.broadcast %42 : vector<1x512xf32> to vector<8x512xf32>
    %44 = arith.mulf %41, %43 : vector<8x512xf32>
    %c56 = arith.constant 56 : index
    %c0_28 = arith.constant 0 : index
    %45 = vector.load %arg9[%c56, %c0_28] : memref<72x512xf32, #tpu.memory_space<vmem>>, vector<8x512xf32>
    tpu.vector_store %arg9[%c56, %c0_28], %44 {strides = array<i32>} : memref<72x512xf32, #tpu.memory_space<vmem>>, vector<8x512xf32>,
    %c495_i32 = arith.constant 495 : i32
    %46 = tpu.dynamic_rotate %0 by %c495_i32 dim 1 : vector<8x512xf32>, i32 -> vector<8x512xf32>
    %c8_29 = arith.constant 8 : index
    %c0_30 = arith.constant 0 : index
    %47 = vector.load %arg1[%c8_29, %c0_30] : memref<9x512xf32, #tpu.memory_space<vmem>>, vector<1x512xf32>
    %48 = vector.broadcast %47 : vector<1x512xf32> to vector<8x512xf32>
    %49 = arith.mulf %46, %48 : vector<8x512xf32>
    %c64 = arith.constant 64 : index
    %c0_31 = arith.constant 0 : index
    %50 = vector.load %arg9[%c64, %c0_31] : memref<72x512xf32, #tpu.memory_space<vmem>>, vector<8x512xf32>
    tpu.vector_store %arg9[%c64, %c0_31], %49 {strides = array<i32>} : memref<72x512xf32, #tpu.memory_space<vmem>>, vector<8x512xf32>,
    %c2_32 = arith.constant 2 : index
    %c0_33 = arith.constant 0 : index
    %c0_34 = arith.constant 0 : index
    %51 = vector.load %arg2[%c2_32, %c0_33, %c0_34] : memref<3x8x24xf32, #tpu.memory_space<vmem>>, vector<1x8x24xf32>
    %52 = vector.shape_cast %51 : vector<1x8x24xf32> to vector<8x24xf32>
    %c48_35 = arith.constant 48 : index
    %c0_36 = arith.constant 0 : index
    %53 = vector.load %arg9[%c48_35, %c0_36] : memref<72x512xf32, #tpu.memory_space<vmem>>, vector<24x512xf32>
    %cst_37 = arith.constant dense<0.000000e+00> : vector<8x512xf32>
    %54 = tpu.matmul %52, %53, %cst_37 {dimension_numbers = #tpu.dot_dimension_numbers<[1], [0], [0], [1], [0, 0, 1, 1], [], []>} : vector<8x24xf32>, vector<24x512xf32>, vector<8x512xf32> -> vector<8x512xf32>
    %55 = arith.addf %35, %54 : vector<8x512xf32>
    %cst_38 = arith.constant dense<0.000000e+00> : vector<8xf32>
    %56 = vector.multi_reduction <add>, %55, %cst_38 [1] : vector<8x512xf32> to vector<8xf32>
    %57 = vector.shape_cast %56 : vector<8xf32> to vector<8x1xf32>
    %cst_39 = arith.constant 5.120000e+02 : f32
    %58 = vector.broadcast %cst_39 : f32 to vector<8x1xf32>
    %59 = arith.divf %57, %58 : vector<8x1xf32>
    %60 = vector.broadcast %59 : vector<8x1xf32> to vector<8x512xf32>
    %61 = arith.subf %55, %60 : vector<8x512xf32>
    %62 = arith.mulf %61, %61 : vector<8x512xf32>
    %cst_40 = arith.constant dense<0.000000e+00> : vector<8xf32>
    %63 = vector.multi_reduction <add>, %62, %cst_40 [1] : vector<8x512xf32> to vector<8xf32>
    %64 = vector.shape_cast %63 : vector<8xf32> to vector<8x1xf32>
    %cst_41 = arith.constant 5.120000e+02 : f32
    %65 = vector.broadcast %cst_41 : f32 to vector<8x1xf32>
    %66 = arith.divf %64, %65 : vector<8x1xf32>
    %cst_42 = arith.constant 9.99999974E-6 : f32
    %67 = vector.broadcast %cst_42 : f32 to vector<8x1xf32>
    %68 = arith.addf %66, %67 : vector<8x1xf32>
    %69 = math.rsqrt %68 : vector<8x1xf32>
    %70 = vector.broadcast %69 : vector<8x1xf32> to vector<8x512xf32>
    %71 = arith.mulf %61, %70 : vector<8x512xf32>
    %c0_43 = arith.constant 0 : index
    %c0_44 = arith.constant 0 : index
    %72 = vector.load %arg3[%c0_43, %c0_44] : memref<8x1xf32, #tpu.memory_space<vmem>>, vector<8x1xf32>
    %73 = vector.broadcast %72 : vector<8x1xf32> to vector<8x512xf32>
    %74 = arith.mulf %71, %73 : vector<8x512xf32>
    %c0_45 = arith.constant 0 : index
    %c0_46 = arith.constant 0 : index
    %75 = vector.load %arg4[%c0_45, %c0_46] : memref<8x1xf32, #tpu.memory_space<vmem>>, vector<8x1xf32>
    %76 = vector.broadcast %75 : vector<8x1xf32> to vector<8x512xf32>
    %77 = arith.addf %74, %76 : vector<8x512xf32>
    %cst_47 = arith.constant 0.000000e+00 : f32
    %78 = vector.broadcast %cst_47 : f32 to vector<8x512xf32>
    %79 = arith.maximumf %77, %78 : vector<8x512xf32>
    %c17_i32_48 = arith.constant 17 : i32
    %80 = tpu.dynamic_rotate %79 by %c17_i32_48 dim 1 : vector<8x512xf32>, i32 -> vector<8x512xf32>
    %c0_49 = arith.constant 0 : index
    %c0_50 = arith.constant 0 : index
    %81 = vector.load %arg1[%c0_49, %c0_50] : memref<9x512xf32, #tpu.memory_space<vmem>>, vector<1x512xf32>
    %82 = vector.broadcast %81 : vector<1x512xf32> to vector<8x512xf32>
    %83 = arith.mulf %80, %82 : vector<8x512xf32>
    %c0_51 = arith.constant 0 : index
    %c0_52 = arith.constant 0 : index
    %84 = vector.load %arg9[%c0_51, %c0_52] : memref<72x512xf32, #tpu.memory_space<vmem>>, vector<8x512xf32>
    tpu.vector_store %arg9[%c0_51, %c0_52], %83 {strides = array<i32>} : memref<72x512xf32, #tpu.memory_space<vmem>>, vector<8x512xf32>,
    %c16_i32_53 = arith.constant 16 : i32
    %85 = tpu.dynamic_rotate %79 by %c16_i32_53 dim 1 : vector<8x512xf32>, i32 -> vector<8x512xf32>
    %c1_54 = arith.constant 1 : index
    %c0_55 = arith.constant 0 : index
    %86 = vector.load %arg1[%c1_54, %c0_55] : memref<9x512xf32, #tpu.memory_space<vmem>>, vector<1x512xf32>
    %87 = vector.broadcast %86 : vector<1x512xf32> to vector<8x512xf32>
    %88 = arith.mulf %85, %87 : vector<8x512xf32>
    %c8_56 = arith.constant 8 : index
    %c0_57 = arith.constant 0 : index
    %89 = vector.load %arg9[%c8_56, %c0_57] : memref<72x512xf32, #tpu.memory_space<vmem>>, vector<8x512xf32>
    tpu.vector_store %arg9[%c8_56, %c0_57], %88 {strides = array<i32>} : memref<72x512xf32, #tpu.memory_space<vmem>>, vector<8x512xf32>,
    %c15_i32_58 = arith.constant 15 : i32
    %90 = tpu.dynamic_rotate %79 by %c15_i32_58 dim 1 : vector<8x512xf32>, i32 -> vector<8x512xf32>
    %c2_59 = arith.constant 2 : index
    %c0_60 = arith.constant 0 : index
    %91 = vector.load %arg1[%c2_59, %c0_60] : memref<9x512xf32, #tpu.memory_space<vmem>>, vector<1x512xf32>
    %92 = vector.broadcast %91 : vector<1x512xf32> to vector<8x512xf32>
    %93 = arith.mulf %90, %92 : vector<8x512xf32>
    %c16_61 = arith.constant 16 : index
    %c0_62 = arith.constant 0 : index
    %94 = vector.load %arg9[%c16_61, %c0_62] : memref<72x512xf32, #tpu.memory_space<vmem>>, vector<8x512xf32>
    tpu.vector_store %arg9[%c16_61, %c0_62], %93 {strides = array<i32>} : memref<72x512xf32, #tpu.memory_space<vmem>>, vector<8x512xf32>,
    %c0_63 = arith.constant 0 : index
    %c0_64 = arith.constant 0 : index
    %c0_65 = arith.constant 0 : index
    %95 = vector.load %arg5[%c0_63, %c0_64, %c0_65] : memref<3x8x24xf32, #tpu.memory_space<vmem>>, vector<1x8x24xf32>
    %96 = vector.shape_cast %95 : vector<1x8x24xf32> to vector<8x24xf32>
    %c0_66 = arith.constant 0 : index
    %c0_67 = arith.constant 0 : index
    %97 = vector.load %arg9[%c0_66, %c0_67] : memref<72x512xf32, #tpu.memory_space<vmem>>, vector<24x512xf32>
    %cst_68 = arith.constant dense<0.000000e+00> : vector<8x512xf32>
    %98 = tpu.matmul %96, %97, %cst_68 {dimension_numbers = #tpu.dot_dimension_numbers<[1], [0], [0], [1], [0, 0, 1, 1], [], []>} : vector<8x24xf32>, vector<24x512xf32>, vector<8x512xf32> -> vector<8x512xf32>
    %c1_i32_69 = arith.constant 1 : i32
    %99 = tpu.dynamic_rotate %79 by %c1_i32_69 dim 1 : vector<8x512xf32>, i32 -> vector<8x512xf32>
    %c3_70 = arith.constant 3 : index
    %c0_71 = arith.constant 0 : index
    %100 = vector.load %arg1[%c3_70, %c0_71] : memref<9x512xf32, #tpu.memory_space<vmem>>, vector<1x512xf32>
    %101 = vector.broadcast %100 : vector<1x512xf32> to vector<8x512xf32>
    %102 = arith.mulf %99, %101 : vector<8x512xf32>
    %c24_72 = arith.constant 24 : index
    %c0_73 = arith.constant 0 : index
    %103 = vector.load %arg9[%c24_72, %c0_73] : memref<72x512xf32, #tpu.memory_space<vmem>>, vector<8x512xf32>
    tpu.vector_store %arg9[%c24_72, %c0_73], %102 {strides = array<i32>} : memref<72x512xf32, #tpu.memory_space<vmem>>, vector<8x512xf32>,
    %c32_74 = arith.constant 32 : index
    %c0_75 = arith.constant 0 : index
    %104 = vector.load %arg9[%c32_74, %c0_75] : memref<72x512xf32, #tpu.memory_space<vmem>>, vector<8x512xf32>
    tpu.vector_store %arg9[%c32_74, %c0_75], %79 {strides = array<i32>} : memref<72x512xf32, #tpu.memory_space<vmem>>, vector<8x512xf32>,
    %c511_i32_76 = arith.constant 511 : i32
    %105 = tpu.dynamic_rotate %79 by %c511_i32_76 dim 1 : vector<8x512xf32>, i32 -> vector<8x512xf32>
    %c5_77 = arith.constant 5 : index
    %c0_78 = arith.constant 0 : index
    %106 = vector.load %arg1[%c5_77, %c0_78] : memref<9x512xf32, #tpu.memory_space<vmem>>, vector<1x512xf32>
    %107 = vector.broadcast %106 : vector<1x512xf32> to vector<8x512xf32>
    %108 = arith.mulf %105, %107 : vector<8x512xf32>
    %c40_79 = arith.constant 40 : index
    %c0_80 = arith.constant 0 : index
    %109 = vector.load %arg9[%c40_79, %c0_80] : memref<72x512xf32, #tpu.memory_space<vmem>>, vector<8x512xf32>
    tpu.vector_store %arg9[%c40_79, %c0_80], %108 {strides = array<i32>} : memref<72x512xf32, #tpu.memory_space<vmem>>, vector<8x512xf32>,
    %c1_81 = arith.constant 1 : index
    %c0_82 = arith.constant 0 : index
    %c0_83 = arith.constant 0 : index
    %110 = vector.load %arg5[%c1_81, %c0_82, %c0_83] : memref<3x8x24xf32, #tpu.memory_space<vmem>>, vector<1x8x24xf32>
    %111 = vector.shape_cast %110 : vector<1x8x24xf32> to vector<8x24xf32>
    %c24_84 = arith.constant 24 : index
    %c0_85 = arith.constant 0 : index
    %112 = vector.load %arg9[%c24_84, %c0_85] : memref<72x512xf32, #tpu.memory_space<vmem>>, vector<24x512xf32>
    %cst_86 = arith.constant dense<0.000000e+00> : vector<8x512xf32>
    %113 = tpu.matmul %111, %112, %cst_86 {dimension_numbers = #tpu.dot_dimension_numbers<[1], [0], [0], [1], [0, 0, 1, 1], [], []>} : vector<8x24xf32>, vector<24x512xf32>, vector<8x512xf32> -> vector<8x512xf32>
    %114 = arith.addf %98, %113 : vector<8x512xf32>
    %c497_i32_87 = arith.constant 497 : i32
    %115 = tpu.dynamic_rotate %79 by %c497_i32_87 dim 1 : vector<8x512xf32>, i32 -> vector<8x512xf32>
    %c6_88 = arith.constant 6 : index
    %c0_89 = arith.constant 0 : index
    %116 = vector.load %arg1[%c6_88, %c0_89] : memref<9x512xf32, #tpu.memory_space<vmem>>, vector<1x512xf32>
    %117 = vector.broadcast %116 : vector<1x512xf32> to vector<8x512xf32>
    %118 = arith.mulf %115, %117 : vector<8x512xf32>
    %c48_90 = arith.constant 48 : index
    %c0_91 = arith.constant 0 : index
    %119 = vector.load %arg9[%c48_90, %c0_91] : memref<72x512xf32, #tpu.memory_space<vmem>>, vector<8x512xf32>
    tpu.vector_store %arg9[%c48_90, %c0_91], %118 {strides = array<i32>} : memref<72x512xf32, #tpu.memory_space<vmem>>, vector<8x512xf32>,
    %c496_i32_92 = arith.constant 496 : i32
    %120 = tpu.dynamic_rotate %79 by %c496_i32_92 dim 1 : vector<8x512xf32>, i32 -> vector<8x512xf32>
    %c7_93 = arith.constant 7 : index
    %c0_94 = arith.constant 0 : index
    %121 = vector.load %arg1[%c7_93, %c0_94] : memref<9x512xf32, #tpu.memory_space<vmem>>, vector<1x512xf32>
    %122 = vector.broadcast %121 : vector<1x512xf32> to vector<8x512xf32>
    %123 = arith.mulf %120, %122 : vector<8x512xf32>
    %c56_95 = arith.constant 56 : index
    %c0_96 = arith.constant 0 : index
    %124 = vector.load %arg9[%c56_95, %c0_96] : memref<72x512xf32, #tpu.memory_space<vmem>>, vector<8x512xf32>
    tpu.vector_store %arg9[%c56_95, %c0_96], %123 {strides = array<i32>} : memref<72x512xf32, #tpu.memory_space<vmem>>, vector<8x512xf32>,
    %c495_i32_97 = arith.constant 495 : i32
    %125 = tpu.dynamic_rotate %79 by %c495_i32_97 dim 1 : vector<8x512xf32>, i32 -> vector<8x512xf32>
    %c8_98 = arith.constant 8 : index
    %c0_99 = arith.constant 0 : index
    %126 = vector.load %arg1[%c8_98, %c0_99] : memref<9x512xf32, #tpu.memory_space<vmem>>, vector<1x512xf32>
    %127 = vector.broadcast %126 : vector<1x512xf32> to vector<8x512xf32>
    %128 = arith.mulf %125, %127 : vector<8x512xf32>
    %c64_100 = arith.constant 64 : index
    %c0_101 = arith.constant 0 : index
    %129 = vector.load %arg9[%c64_100, %c0_101] : memref<72x512xf32, #tpu.memory_space<vmem>>, vector<8x512xf32>
    tpu.vector_store %arg9[%c64_100, %c0_101], %128 {strides = array<i32>} : memref<72x512xf32, #tpu.memory_space<vmem>>, vector<8x512xf32>,
    %c2_102 = arith.constant 2 : index
    %c0_103 = arith.constant 0 : index
    %c0_104 = arith.constant 0 : index
    %130 = vector.load %arg5[%c2_102, %c0_103, %c0_104] : memref<3x8x24xf32, #tpu.memory_space<vmem>>, vector<1x8x24xf32>
    %131 = vector.shape_cast %130 : vector<1x8x24xf32> to vector<8x24xf32>
    %c48_105 = arith.constant 48 : index
    %c0_106 = arith.constant 0 : index
    %132 = vector.load %arg9[%c48_105, %c0_106] : memref<72x512xf32, #tpu.memory_space<vmem>>, vector<24x512xf32>
    %cst_107 = arith.constant dense<0.000000e+00> : vector<8x512xf32>
    %133 = tpu.matmul %131, %132, %cst_107 {dimension_numbers = #tpu.dot_dimension_numbers<[1], [0], [0], [1], [0, 0, 1, 1], [], []>} : vector<8x24xf32>, vector<24x512xf32>, vector<8x512xf32> -> vector<8x512xf32>
    %134 = arith.addf %114, %133 : vector<8x512xf32>
    %cst_108 = arith.constant dense<0.000000e+00> : vector<8xf32>
    %135 = vector.multi_reduction <add>, %134, %cst_108 [1] : vector<8x512xf32> to vector<8xf32>
    %136 = vector.shape_cast %135 : vector<8xf32> to vector<8x1xf32>
    %cst_109 = arith.constant 5.120000e+02 : f32
    %137 = vector.broadcast %cst_109 : f32 to vector<8x1xf32>
    %138 = arith.divf %136, %137 : vector<8x1xf32>
    %139 = vector.broadcast %138 : vector<8x1xf32> to vector<8x512xf32>
    %140 = arith.subf %134, %139 : vector<8x512xf32>
    %141 = arith.mulf %140, %140 : vector<8x512xf32>
    %cst_110 = arith.constant dense<0.000000e+00> : vector<8xf32>
    %142 = vector.multi_reduction <add>, %141, %cst_110 [1] : vector<8x512xf32> to vector<8xf32>
    %143 = vector.shape_cast %142 : vector<8xf32> to vector<8x1xf32>
    %cst_111 = arith.constant 5.120000e+02 : f32
    %144 = vector.broadcast %cst_111 : f32 to vector<8x1xf32>
    %145 = arith.divf %143, %144 : vector<8x1xf32>
    %cst_112 = arith.constant 9.99999974E-6 : f32
    %146 = vector.broadcast %cst_112 : f32 to vector<8x1xf32>
    %147 = arith.addf %145, %146 : vector<8x1xf32>
    %148 = math.rsqrt %147 : vector<8x1xf32>
    %149 = vector.broadcast %148 : vector<8x1xf32> to vector<8x512xf32>
    %150 = arith.mulf %140, %149 : vector<8x512xf32>
    %c0_113 = arith.constant 0 : index
    %c0_114 = arith.constant 0 : index
    %151 = vector.load %arg6[%c0_113, %c0_114] : memref<8x1xf32, #tpu.memory_space<vmem>>, vector<8x1xf32>
    %152 = vector.broadcast %151 : vector<8x1xf32> to vector<8x512xf32>
    %153 = arith.mulf %150, %152 : vector<8x512xf32>
    %c0_115 = arith.constant 0 : index
    %c0_116 = arith.constant 0 : index
    %154 = vector.load %arg7[%c0_115, %c0_116] : memref<8x1xf32, #tpu.memory_space<vmem>>, vector<8x1xf32>
    %155 = vector.broadcast %154 : vector<8x1xf32> to vector<8x512xf32>
    %156 = arith.addf %153, %155 : vector<8x512xf32>
    %157 = arith.addf %156, %0 : vector<8x512xf32>
    %cst_117 = arith.constant 0.000000e+00 : f32
    %158 = vector.broadcast %cst_117 : f32 to vector<8x512xf32>
    %159 = arith.maximumf %157, %158 : vector<8x512xf32>
    %c0_118 = arith.constant 0 : index
    %c0_119 = arith.constant 0 : index
    %160 = vector.load %arg8[%c0_118, %c0_119] : memref<8x512xf32, #tpu.memory_space<vmem>>, vector<8x512xf32>
    tpu.vector_store %arg8[%c0_118, %c0_119], %159 {strides = array<i32>} : memref<8x512xf32, #tpu.memory_space<vmem>>, vector<8x512xf32>,
    return
  }
}

</mosaic_0001>

<bundles_post_ra>
// kernel: tpu_custom_call.1
= control target key start
LH: loop header
LB: loop body
LE: loop exit
PB: predicated region body
PF: predicated region fallthrough
CT: control target
= control target key end

     0   :  { %13 = vsyncpa [#allocation4], 0  ;;  %s2602_s0 = inlined_call_operand.vmem [shape: f32[8,512], index: 0, kind: input, shape index: {}]   ;;  %s2603_s1 = inlined_call_operand.hbm [shape: f32[9,512], index: 1, kind: input, shape index: {}]   ;;  %s2604_s2 = inlined_call_operand.hbm [shape: f32[3,8,24], index: 2, kind: input, shape index: {}]   ;;  %s2605_s3 = inlined_call_operand.vmem [shape: f32[8,1], index: 3, kind: input, shape index: {}]   ;;  %s2606_s4 = inlined_call_operand.vmem [shape: f32[8,1], index: 4, kind: input, shape index: {}]   ;;  %s2607_s5 = inlined_call_operand.hbm [shape: f32[3,8,24], index: 5, kind: input, shape index: {}]   ;;  %s2608_s6 = inlined_call_operand.vmem [shape: f32[8,1], index: 6, kind: input, shape index: {}]   ;;  %s2609_s7 = inlined_call_operand.vmem [shape: f32[8,1], index: 7, kind: input, shape index: {}]   ;;  %s2610_s8 = inlined_call_operand.hbm [shape: f32[8,512], index: 8, kind: output, shape index: {}]  }
   0x1   :  { %14 = vsyncpa [#allocation7], 0 }
   0x2   :  { %15 = vsyncpa [#allocation5], 0  ;;  %s2056_s27 = smov [#allocation6]   ;;  %s1962_s9 = scalar_lea.hbm %s2604_s2, 384 }
   0x3   :  { %s35_s28 = sshll.u32 %s2056_s27, 4  ;;  %p1963_p0 = scmp.ne.s32.totalorder %s2604_s2, %s1962_s9  ;;  %s36_s28 = int_to_ptr.vmem [resolvable:$true] %s35_s28 }
   0x4   :  { %p1966_p1 = scmp.lt.u32.totalorder %s1962_s9, %s2604_s2 }
   0x6   :  { %p1968_p2 = pnand %p1966_p1, %p1963_p0 }
   0x8   :  { %1971 = shalt.err (!%p1968_p2)
}
   0x9   :  { %s1972_s14 = scalar_lea.vmem %s36_s28, 384  ;;  %p1977_p4 = scmp.lt.s32.totalorder %s36_s28, %s36_s28 }
   0xa   :  { %p1973_p3 = scmp.ne.s32.totalorder %s36_s28, %s1972_s14  ;;  %p1978_p5 = scmp.lt.s32.totalorder %s1972_s14, %s1972_s14 }
   0xc   :  { %p1979_p6 = por %p1978_p5, %p1977_p4 }
   0xe   :  { %p1980_p7 = pnand %p1979_p6, %p1973_p3 }
  0x10   :  { %1983 = shalt.err (!%p1980_p7)
}
  0x11   :  { %s2057_s15 = smov 128   ;;  %s2058_s16 = smov 8  }
  0x12   :  { %41 = dma.hbm_to_vmem [thread:$0]  %s2604_s2, 384, %s36_s28, [#allocation7], %s2057_s15, %s2057_s15, %s2058_s16  }
  0x13   :  { %s2059_s19 = smov [#allocation3]   ;;  %s1984_s23 = scalar_lea.hbm %s2603_s1, 1024 }
  0x14   :  { %s23_s20 = sshll.u32 %s2059_s19, 4  ;;  %p1985_p8 = scmp.ne.s32.totalorder %s2603_s1, %s1984_s23  ;;  %s24_s20 = int_to_ptr.vmem [resolvable:$true] %s23_s20 }
  0x15   :  { %p1988_p9 = scmp.lt.u32.totalorder %s1984_s23, %s2603_s1 }
  0x17   :  { %p1990_p10 = pnand %p1988_p9, %p1985_p8 }
  0x19   :  { %1993 = shalt.err (!%p1990_p10)
}
  0x1a   :  { %s1994_s29 = scalar_lea.vmem %s24_s20, 1024  ;;  %p1999_p12 = scmp.lt.s32.totalorder %s24_s20, %s24_s20 }
  0x1b   :  { %p1995_p11 = scmp.ne.s32.totalorder %s24_s20, %s1994_s29  ;;  %p2000_p13 = scmp.lt.s32.totalorder %s1994_s29, %s1994_s29 }
  0x1d   :  { %p2001_p0 = por %p2000_p13, %p1999_p12 }
  0x1f   :  { %p2002_p1 = pnand %p2001_p0, %p1995_p11 }
  0x21   :  { %2005 = shalt.err (!%p2002_p1)
}
  0x22   :  { %s2060_s2 = smov 512   ;;  %s2061_s28 = smov 32  }
  0x23   :  { %29 = dma.hbm_to_vmem [thread:$0]  %s2603_s1, 1024, %s24_s20, [#allocation4], %s2060_s2, %s2060_s2, %s2061_s28  }
  0x24   :  { %s2062_s10 = smov [#allocation8]   ;;  %s2006_s14 = scalar_lea.hbm %s2607_s5, 384 }
  0x25   :  { %s51_s11 = sshll.u32 %s2062_s10, 4  ;;  %p2007_p2 = scmp.ne.s32.totalorder %s2607_s5, %s2006_s14  ;;  %s52_s11 = int_to_ptr.vmem [resolvable:$true] %s51_s11 }
  0x26   :  { %p2010_p3 = scmp.lt.u32.totalorder %s2006_s14, %s2607_s5 }
  0x28   :  { %p2012_p4 = pnand %p2010_p3, %p2007_p2 }
  0x2a   :  { %2015 = shalt.err (!%p2012_p4)
}
  0x2b   :  { %s2016_s22 = scalar_lea.vmem %s52_s11, 384  ;;  %p2021_p6 = scmp.lt.s32.totalorder %s52_s11, %s52_s11 }
  0x2c   :  { %p2017_p5 = scmp.ne.s32.totalorder %s52_s11, %s2016_s22  ;;  %p2022_p7 = scmp.lt.s32.totalorder %s2016_s22, %s2016_s22 }
  0x2e   :  { %p2023_p8 = por %p2022_p7, %p2021_p6 }
  0x30   :  { %p2024_p9 = pnand %p2023_p8, %p2017_p5 }
  0x32   :  { %2027 = shalt.err (!%p2024_p9)
}
  0x33   :  { %57 = dma.hbm_to_vmem [thread:$0]  %s2607_s5, 384, %s52_s11, [#allocation7], %s2057_s15, %s2057_s15, %s2058_s16  }
  0x34   :  { %2050 = dma.done.wait [#allocation4], 1024  }
  0x35   :  { %2051 = vsyncadd [#allocation4], 4294966272 }
  0x36   :  { %2052 = dma.done.wait [#allocation7], 768  }
  0x37   :  { %2053 = vsyncadd [#allocation7], 4294966528  ;;  %v2164_v0 = vld [vmem:[%s2602_s0 + $0x18] sm:$0xff]  ;;  %v2169_v1 = vld [vmem:[%s2602_s0] sm:$0xff]  ;;  %s2063_s27 = smov 1   ;;  %s2064_s2 = smov 127   ;;  %v83_v5 = vlaneseq }
  0x38   :  { %227 = vrot.lane.b32.xlu1 %v2164_v0, %s2063_s27  ;;  %221 = vrot.lane.b32.xlu0 %v2169_v1, %s2063_s27  ;;  %v2178_v2 = vld [vmem:[%s2602_s0 + $0x10] sm:$0xff]  ;;  %v2183_v3 = vld [vmem:[%s2602_s0 + $0x8] sm:$0xff]  ;;  %s2065_s28 = smov 17   ;;  %s2066_s30 = smov 16   ;;  %v2067_v4 = vmov 0.0   ;;  %vm327_vm2 = vcmask 195584  }
  0x39   :  { %395 = vmatprep.mubr.f32.mxu0 %v2067_v4  ;;  %466 = vmatprep.mubr.f32.mxu1 %v2067_v4  ;;  %s2068_s9 = smov 15   ;;  %s2069_s10 = smov 113   ;;  %v93_v6 = vshrl.u32 %v83_v5, 7  ;;  %v2247_v7 = vand.u32 127, %v83_v5  ;;  %v314_v44 = vld [vmem:[#allocation6 + $0x8] sm:$0xff] }
  0x3a   :  { %s2070_s11 = smov 112   ;;  %s2071_s12 = smov 111   ;;  %v235_v12 = vld [vmem:[#allocation3 + $0x3] ss:$8 sm:$0xf] }
  0x3b   :  { %v2249_v8 = vsub.s32 0, %v93_v6  ;;  %v2251_v9 = vsub.s32 1, %v93_v6  ;;  %v2253_v10 = vsub.s32 2, %v93_v6  ;;  %v2255_v11 = vsub.s32 3, %v93_v6 }
  0x3c   :  { %225 = vrot.lane.b32.xlu1 %v2178_v2, %s2063_s27  ;;  %223 = vrot.lane.b32.xlu0 %v2183_v3, %s2063_s27  ;;  %vm229_vm0 = vcmp.lt.s32.totalorder %v2247_v7, 1  ;;  %v2264_v20 = vld [vmem:[#allocation3 + $0x5] ss:$8 sm:$0xf]  ;;  %vm277_vm1 = vcmp.lt.s32.totalorder %v2247_v7, 127  ;;  %vm85_vm3 = vcmp.lt.s32.totalorder %v2247_v7, 17 }
  0x3d   :  { %v240_v15 = vrot.slane %v235_v12, %v2249_v8  ;;  %v248_v17 = vrot.slane %v235_v12, %v2253_v10  ;;  %v244_v18 = vrot.slane %v235_v12, %v2251_v9  ;;  %v252_v19 = vrot.slane %v235_v12, %v2255_v11  ;;  %v90_v45 = vld [vmem:[#allocation3] ss:$8 sm:$0xf]  ;;  %v134_v46 = vld [vmem:[#allocation3 + $0x1] ss:$8 sm:$0xf] }
  0x3e   :  { %v292_v28 = vrot.slane %v2264_v20, %v2251_v9  ;;  %v288_v39 = vrot.slane %v2264_v20, %v2249_v8  ;;  %v99_v49 = vrot.slane %v90_v45, %v2251_v9  ;;  %vm128_vm4 = vcmp.lt.s32.totalorder %v2247_v7, 16 }
  0x3f   :  { %v143_v50 = vrot.slane %v134_v46, %v2251_v9  ;;  %v95_v54 = vrot.slane %v90_v45, %v2249_v8  ;;  %v296_v56 = vrot.slane %v2264_v20, %v2253_v10  ;;  %v300_v59 = vrot.slane %v2264_v20, %v2255_v11 }
  0x40   :  { %273 = vrot.lane.b32.xlu1 %v2178_v2, %s2064_s2  ;;  %271 = vrot.lane.b32.xlu0 %v2183_v3, %s2064_s2  ;;  %v139_v60 = vrot.slane %v134_v46, %v2249_v8  ;;  %vm172_vm5 = vcmp.lt.s32.totalorder %v2247_v7, 15  ;;  %vm626_vm6 = vcmp.lt.s32.totalorder %v2247_v7, 113  ;;  %vm670_vm7 = vcmp.lt.s32.totalorder %v2247_v7, 112 }
  0x41   :  { %vm714_vm8 = vcmp.lt.s32.totalorder %v2247_v7, 111  ;;  %v1810_v7 = vld [vmem:[%s2608_s6] sm:$0xff]  ;;  %s2073_s6 = smov [#allocation9]  }
  0x44   :  { %75 = vrot.lane.b32.xlu1 %v2169_v1, %s2065_s28  ;;  %269 = vrot.lane.b32.xlu0 %v2169_v1, %s2064_s2 }
  0x48   :  { %120 = vrot.lane.b32.xlu1 %v2169_v1, %s2066_s30  ;;  %77 = vrot.lane.b32.xlu0 %v2183_v3, %s2065_s28 }
  0x4c   :  { %81 = vrot.lane.b32.xlu1 %v2164_v0, %s2065_s28  ;;  %122 = vrot.lane.b32.xlu0 %v2183_v3, %s2066_s30 }
  0x50   :  { %275 = vrot.lane.b32.xlu1 %v2164_v0, %s2064_s2  ;;  %126 = vrot.lane.b32.xlu0 %v2164_v0, %s2066_s30 }
  0x54   :  { %124 = vrot.lane.b32.xlu1 %v2178_v2, %s2066_s30  ;;  %79 = vrot.lane.b32.xlu0 %v2178_v2, %s2065_s28 }
  0x58   :  { %166 = vrot.lane.b32.xlu1 %v2183_v3, %s2068_s9  ;;  %164 = vrot.lane.b32.xlu0 %v2169_v1, %s2068_s9 }
  0x5c   :  { %620 = vrot.lane.b32.xlu1 %v2183_v3, %s2069_s10  ;;  %170 = vrot.lane.b32.xlu0 %v2164_v0, %s2068_s9 }
  0x60   :  { %664 = vrot.lane.b32.xlu1 %v2183_v3, %s2070_s11  ;;  %622 = vrot.lane.b32.xlu0 %v2178_v2, %s2069_s10 }
  0x64   :  { %168 = vrot.lane.b32.xlu1 %v2178_v2, %s2068_s9  ;;  %666 = vrot.lane.b32.xlu0 %v2178_v2, %s2070_s11 }
  0x68   :  { %662 = vrot.lane.b32.xlu1 %v2169_v1, %s2070_s11  ;;  %618 = vrot.lane.b32.xlu0 %v2169_v1, %s2069_s10 }
  0x6c   :  { %668 = vrot.lane.b32.xlu1 %v2164_v0, %s2070_s11  ;;  %624 = vrot.lane.b32.xlu0 %v2164_v0, %s2069_s10 }
  0x70   :  { %710 = vrot.lane.b32.xlu1 %v2178_v2, %s2071_s12  ;;  %708 = vrot.lane.b32.xlu0 %v2183_v3, %s2071_s12 }
  0x74   :  { %712 = vrot.lane.b32.xlu1 %v2164_v0, %s2071_s12  ;;  %706 = vrot.lane.b32.xlu0 %v2169_v1, %s2071_s12 }
  0xaa   :  { %v228_v13 = vpop.permute.xlu1 %227  ;;  %v222_v14 = vpop.permute.xlu0 %221 }
  0xab   :  { %v233_v16 = vsel %vm229_vm0, %v228_v13, %v222_v14 }
  0xac   :  { %v257_v23 = vmul.f32 %v240_v15, %v233_v16 }
  0xae   :  { %v226_v21 = vpop.permute.xlu1 %225  ;;  %v224_v22 = vpop.permute.xlu0 %223  ;;  %v1872_v37 = vpack.c.bf16 %v2169_v1, %v257_v23  ;;  %v147_v1 = vrot.slane %v134_v46, %v2253_v10 }
  0xaf   :  { %v230_v24 = vsel %vm229_vm0, %v226_v21, %v228_v13  ;;  %v231_v25 = vsel %vm229_vm0, %v224_v22, %v226_v21  ;;  %v232_v26 = vsel %vm229_vm0, %v222_v14, %v224_v22  ;;  %v107_v13 = vrot.slane %v90_v45, %v2255_v11  ;;  %v2313_v14 = vld [vmem:[#allocation3 + $0x2] ss:$8 sm:$0xf] }
  0xb0   :  { %v259_v27 = vmul.f32 %v248_v17, %v231_v25  ;;  %v258_v29 = vmul.f32 %v244_v18, %v232_v26  ;;  %v260_v30 = vmul.f32 %v252_v19, %v230_v24  ;;  %v187_v22 = vrot.slane %v2313_v14, %v2251_v9 }
  0xb2   :  { %v274_v31 = vpop.permute.xlu1 %273  ;;  %v272_v32 = vpop.permute.xlu0 %271  ;;  %v1870_v33 = vpack.c.bf16 %v2183_v3, %v258_v29  ;;  %v1874_v34 = vpack.c.bf16 %v2164_v0, %v260_v30  ;;  %v1876_v35 = vpack.c.bf16 %v2178_v2, %v259_v27  ;;  %v151_v2 = vrot.slane %v134_v46, %v2255_v11 }
  0xb3   :  { %v279_v36 = vsel %vm277_vm1, %v272_v32, %v274_v31  ;;  %v103_v3 = vrot.slane %v90_v45, %v2253_v10 }
  0xb4   :  { %v306_v38 = vmul.f32 %v292_v28, %v279_v36  ;;  %1871 = vmatprep.subr.bf16.mxu0 %v1870_v33  ;;  %1875 = vmatprep.subr.bf16.mxu1 %v1874_v34 }
  0xb5   :  { %1873 = vmatpush1.bf16.msra.mxu0 %v1872_v37  ;;  %1877 = vmatpush1.bf16.msra.mxu1 %v1876_v35  ;;  %v183_v37 = vrot.slane %v2313_v14, %v2249_v8 }
  0xb6   :  { %v76_v40 = vpop.permute.xlu1 %75  ;;  %335 = vmatprep.subr.mxu0 %v306_v38  ;;  %v270_v41 = vpop.permute.xlu0 %269 }
  0xb7   :  { %v280_v42 = vsel %vm277_vm1, %v270_v41, %v272_v32 }
  0xb8   :  { %v305_v43 = vmul.f32 %v288_v39, %v280_v42  ;;  %v632_v42 = vld [vmem:[#allocation3 + $0x6] ss:$8 sm:$0xf] }
  0xba   :  { %v121_v47 = vpop.permute.xlu1 %120  ;;  %336 = vmatpush1.msra.mxu0 %v305_v43  ;;  %v78_v48 = vpop.permute.xlu0 %77  ;;  %v208_v43 = vld [vmem:[#allocation6] sm:$0xff] }
  0xbb   :  { %1858 = vmatmul.mubr.msk.f32.vlgmr.msra.gmra.mrb[0].mxu0 %vm327_vm2, %v314_v44  ;;  %v88_v51 = vsel %vm85_vm3, %v76_v40, %v78_v48 }
  0xbc   :  { %540 = vmatprep.mubr.f32.mxu0 %v2067_v4  ;;  %v113_v57 = vmul.f32 %v99_v49, %v88_v51  ;;  %v195_v49 = vrot.slane %v2313_v14, %v2255_v11 }
  0xbe   :  { %v82_v52 = vpop.permute.xlu1 %81  ;;  %v123_v53 = vpop.permute.xlu0 %122 }
  0xbf   :  { %v131_v55 = vsel %vm128_vm4, %v121_v47, %v123_v53  ;;  %v89_v61 = vsel %vm85_vm3, %v82_v52, %v76_v40 }
  0xc0   :  { %v157_v58 = vmul.f32 %v143_v50, %v131_v55  ;;  %v112_v15 = vmul.f32 %v95_v54, %v89_v61 }
  0xc2   :  { %v276_v62 = vpop.permute.xlu1 %275  ;;  %v127_v63 = vpop.permute.xlu0 %126  ;;  %v1878_v0 = vpack.c.bf16 %v157_v58, %v113_v57  ;;  %v637_v58 = vrot.slane %v632_v42, %v2249_v8 }
  0xc3   :  { %v278_v5 = vsel %vm277_vm1, %v274_v31, %v276_v62  ;;  %v281_v6 = vsel %vm277_vm1, %v276_v62, %v270_v41  ;;  %v132_v12 = vsel %vm128_vm4, %v127_v63, %v121_v47  ;;  %v641_v47 = vrot.slane %v632_v42, %v2251_v9 }
  0xc4   :  { %v307_v16 = vmul.f32 %v296_v56, %v278_v5  ;;  %v308_v17 = vmul.f32 %v300_v59, %v281_v6  ;;  %v156_v18 = vmul.f32 %v139_v60, %v132_v12  ;;  %1879 = vmatprep.subr.bf16.mxu0 %v1878_v0  ;;  %v645_v12 = vrot.slane %v632_v42, %v2253_v10 }
  0xc6   :  { %v1880_v19 = vpack.c.bf16 %v156_v18, %v112_v15  ;;  %v125_v20 = vpop.permute.xlu1 %124  ;;  %406 = vmatprep.subr.mxu1 %v308_v17  ;;  %v80_v21 = vpop.permute.xlu0 %79 }
  0xc7   :  { %v129_v23 = vsel %vm128_vm4, %v125_v20, %v127_v63  ;;  %v130_v24 = vsel %vm128_vm4, %v123_v53, %v125_v20  ;;  %v86_v25 = vsel %vm85_vm3, %v80_v21, %v82_v52  ;;  %v87_v26 = vsel %vm85_vm3, %v78_v48, %v80_v21  ;;  %407 = vmatpush1.msra.mxu1 %v307_v16 }
  0xc8   :  { %v158_v27 = vmul.f32 %v147_v1, %v130_v24  ;;  %v159_v28 = vmul.f32 %v151_v2, %v129_v23  ;;  %v114_v29 = vmul.f32 %v103_v3, %v87_v26  ;;  %v115_v30 = vmul.f32 %v107_v13, %v86_v25  ;;  %1881 = vmatpush1.bf16.msra.mxu0 %v1880_v19  ;;  %v720_v13 = vld [vmem:[#allocation3 + $0x20] ss:$8 sm:$0xf] }
  0xc9   :  { %1859 = vmatmul.mubr.msk.f32.vlgmr.msra.gmra.mrb[0].mxu1 %vm327_vm2, %v314_v44  ;;  %v676_v44 = vld [vmem:[#allocation3 + $0x7] ss:$8 sm:$0xf]  ;;  %v191_v48 = vrot.slane %v2313_v14, %v2253_v10  ;;  %v649_v16 = vrot.slane %v632_v42, %v2255_v11  ;;  %v729_v20 = vrot.slane %v720_v13, %v2251_v9 }
  0xca   :  { %v1884_v31 = vpack.c.bf16 %v158_v27, %v114_v29  ;;  %v167_v32 = vpop.permute.xlu1 %166  ;;  %v165_v33 = vpop.permute.xlu0 %164  ;;  %v1882_v34 = vpack.c.bf16 %v159_v28, %v115_v30  ;;  %611 = vmatprep.mubr.f32.mxu1 %v2067_v4  ;;  %v685_v50 = vrot.slane %v676_v44, %v2251_v9  ;;  %v681_v54 = vrot.slane %v676_v44, %v2249_v8 }
  0xcb   :  { %v175_v35 = vsel %vm172_vm5, %v165_v33, %v167_v32  ;;  %v689_v2 = vrot.slane %v676_v44, %v2253_v10  ;;  %v693_v6 = vrot.slane %v676_v44, %v2255_v11 }
  0xcc   :  { %v201_v36 = vmul.f32 %v187_v22, %v175_v35  ;;  %1883 = vmatprep.subr.bf16.mxu1 %v1882_v34  ;;  %v733_v35 = vrot.slane %v720_v13, %v2253_v10 }
  0xcd   :  { %1885 = vmatpush1.bf16.msra.mxu1 %v1884_v31 }
  0xce   :  { %v621_v38 = vpop.permute.xlu1 %620  ;;  %480 = vmatprep.subr.mxu0 %v201_v36  ;;  %v171_v39 = vpop.permute.xlu0 %170  ;;  %v725_v36 = vrot.slane %v720_v13, %v2249_v8 }
  0xcf   :  { %v176_v40 = vsel %vm172_vm5, %v171_v39, %v165_v33 }
  0xd0   :  { %v200_v41 = vmul.f32 %v183_v37, %v176_v40  ;;  %v737_v37 = vrot.slane %v720_v13, %v2255_v11 }
  0xd2   :  { %v665_v45 = vpop.permute.xlu1 %664  ;;  %481 = vmatpush1.msra.mxu0 %v200_v41  ;;  %v623_v46 = vpop.permute.xlu0 %622 }
  0xd3   :  { %1860 = vmatmul.mubr.msk.f32.vlgmr.msra.gmra.mrb[0].mxu0 %vm327_vm2, %v208_v43  ;;  %v628_v51 = vsel %vm626_vm6, %v621_v38, %v623_v46 }
  0xd4   :  { %831 = vmatprep.mubr.f32.mxu0 %v2067_v4  ;;  %v655_v59 = vmul.f32 %v641_v47, %v628_v51 }
  0xd6   :  { %v169_v52 = vpop.permute.xlu1 %168  ;;  %v667_v53 = vpop.permute.xlu0 %666 }
  0xd7   :  { %v173_v55 = vsel %vm172_vm5, %v169_v52, %v171_v39  ;;  %v174_v56 = vsel %vm172_vm5, %v167_v32, %v169_v52  ;;  %v672_v57 = vsel %vm670_vm7, %v665_v45, %v667_v53 }
  0xd8   :  { %v202_v60 = vmul.f32 %v191_v48, %v174_v56  ;;  %v203_v61 = vmul.f32 %v195_v49, %v173_v55  ;;  %v699_v62 = vmul.f32 %v685_v50, %v672_v57  ;;  %v2072_v55 = vmov 0  }
  0xd9   :  { %1952 = vset.pattern.permute.xlu0 %v2072_v55  ;;  %1953 = vset.pattern.permute.xlu1 %v2072_v55 }
  0xda   :  { %v663_v63 = vpop.permute.xlu1 %662  ;;  %551 = vmatprep.subr.mxu1 %v203_v61  ;;  %v619_v0 = vpop.permute.xlu0 %618  ;;  %v1886_v1 = vpack.c.bf16 %v699_v62, %v655_v59 }
  0xdb   :  { %v673_v3 = vsel %vm670_vm7, %v663_v63, %v665_v45  ;;  %v629_v5 = vsel %vm626_vm6, %v619_v0, %v621_v38  ;;  %552 = vmatpush1.msra.mxu1 %v202_v60 }
  0xdc   :  { %v698_v14 = vmul.f32 %v681_v54, %v673_v3  ;;  %v654_v15 = vmul.f32 %v637_v58, %v629_v5  ;;  %1887 = vmatprep.subr.bf16.mxu0 %v1886_v1  ;;  %1861 = vmatmul.mubr.msk.f32.vlgmr.msra.gmra.mrb[0].mxu1 %vm327_vm2, %v208_v43  ;;  %v940_v54 = vld [vmem:[%s2605_s3] sm:$0xff] }
  0xdd   :  { %902 = vmatprep.mubr.f32.mxu1 %v2067_v4 }
  0xde   :  { %v1888_v17 = vpack.c.bf16 %v698_v14, %v654_v15  ;;  %v669_v18 = vpop.permute.xlu1 %668  ;;  %v625_v19 = vpop.permute.xlu0 %624 }
  0xdf   :  { %v671_v21 = vsel %vm670_vm7, %v667_v53, %v669_v18  ;;  %v674_v22 = vsel %vm670_vm7, %v669_v18, %v663_v63  ;;  %v627_v23 = vsel %vm626_vm6, %v623_v46, %v625_v19  ;;  %v630_v24 = vsel %vm626_vm6, %v625_v19, %v619_v0  ;;  %v751_v46 = vld [vmem:[#allocation6 + $0x10] sm:$0xff] }
  0xe0   :  { %v700_v25 = vmul.f32 %v689_v2, %v671_v21  ;;  %v701_v26 = vmul.f32 %v693_v6, %v674_v22  ;;  %v656_v27 = vmul.f32 %v645_v12, %v627_v23  ;;  %v657_v28 = vmul.f32 %v649_v16, %v630_v24  ;;  %1889 = vmatpush1.bf16.msra.mxu0 %v1888_v17  ;;  %v950_v6 = vld [vmem:[%s2606_s4] sm:$0xff] }
  0xe2   :  { %v1892_v29 = vpack.c.bf16 %v700_v25, %v656_v27  ;;  %v711_v30 = vpop.permute.xlu1 %710  ;;  %v709_v31 = vpop.permute.xlu0 %708  ;;  %v1890_v32 = vpack.c.bf16 %v701_v26, %v657_v28 }
  0xe3   :  { %v716_v33 = vsel %vm714_vm8, %v709_v31, %v711_v30 }
  0xe4   :  { %v743_v34 = vmul.f32 %v729_v20, %v716_v33  ;;  %1891 = vmatprep.subr.bf16.mxu1 %v1890_v32 }
  0xe5   :  { %1893 = vmatpush1.bf16.msra.mxu1 %v1892_v29 }
  0xe6   :  { %v713_v38 = vpop.permute.xlu1 %712  ;;  %771 = vmatprep.subr.mxu0 %v743_v34  ;;  %v707_v39 = vpop.permute.xlu0 %706  ;;  %v1115_v34 = vld [vmem:[#allocation3 + $0x3] ss:$8 sm:$0xf] }
  0xe7   :  { %v715_v40 = vsel %vm714_vm8, %v711_v30, %v713_v38  ;;  %v717_v41 = vsel %vm714_vm8, %v707_v39, %v709_v31  ;;  %v718_v42 = vsel %vm714_vm8, %v713_v38, %v707_v39 }
  0xe8   :  { %v744_v43 = vmul.f32 %v733_v35, %v715_v40  ;;  %v742_v44 = vmul.f32 %v725_v36, %v717_v41  ;;  %v745_v45 = vmul.f32 %v737_v37, %v718_v42  ;;  %v1124_v37 = vrot.slane %v1115_v34, %v2251_v9 }
  0xe9   :  { %v1120_v42 = vrot.slane %v1115_v34, %v2249_v8 }
  0xea   :  { %772 = vmatpush1.msra.mxu0 %v742_v44  ;;  %842 = vmatprep.subr.mxu1 %v745_v45 }
  0xeb   :  { %1862 = vmatmul.mubr.msk.f32.vlgmr.msra.gmra.mrb[0].mxu0 %vm327_vm2, %v751_v46  ;;  %843 = vmatpush1.msra.mxu1 %v744_v43 }
  0xec   :  { %1863 = vmatmul.mubr.msk.f32.vlgmr.msra.gmra.mrb[0].mxu1 %vm327_vm2, %v751_v46  ;;  %1272 = vmatprep.mubr.f32.mxu0 %v2067_v4 }
  0xed   :  { %1343 = vmatprep.mubr.f32.mxu1 %v2067_v4 }
 0x1be   :  { %v833_v47 = vpop.f32.mrb[0].mxu0 }
 0x1bf   :  { %v835_v48 = vpop.f32.mrb[1].mxu0  ;;  %v904_v49 = vpop.f32.mrb[0].mxu1 }
 0x1c0   :  { %v913_v50 = vadd.f32 %v835_v48, %v833_v47  ;;  %v906_v51 = vpop.f32.mrb[1].mxu1 }
 0x1c2   :  { %v914_v52 = vadd.f32 %v913_v50, %v904_v49 }
 0x1c4   :  { %v915_v53 = vadd.f32 %v914_v52, %v906_v51 }
 0x1c6   :  { %916 = vadd.xlane.f32.xlu0 %v915_v53 }
 0x1dc   :  { %943 = vperm.xlu0 %1952, %v940_v54  }
 0x253   :  { %v917_v56 = vpop.xlane.xlu0 %916 }
 0x254   :  { %v919_v57 = vmul.f32 0.001953125, %v917_v56 }
 0x256   :  { %v920_v58 = vsub.f32 %v833_v47, %v919_v57  ;;  %v921_v59 = vsub.f32 %v835_v48, %v919_v57  ;;  %v922_v60 = vsub.f32 %v904_v49, %v919_v57  ;;  %v923_v61 = vsub.f32 %v906_v51, %v919_v57 }
 0x257   :  { %v1128_v48 = vrot.slane %v1115_v34, %v2253_v10  ;;  %v1132_v49 = vrot.slane %v1115_v34, %v2255_v11 }
 0x258   :  { %v924_v62 = vmul.f32 %v920_v58, %v920_v58  ;;  %v925_v63 = vmul.f32 %v921_v59, %v921_v59  ;;  %v926_v0 = vmul.f32 %v922_v60, %v922_v60  ;;  %v927_v2 = vmul.f32 %v923_v61, %v923_v61 }
 0x25a   :  { %v928_v1 = vadd.f32 %v925_v63, %v924_v62 }
 0x25b   :  { %v944_v16 = vpop.permute.xlu0 %943 }
 0x25c   :  { %v929_v3 = vadd.f32 %v928_v1, %v926_v0 }
 0x25e   :  { %v930_v5 = vadd.f32 %v929_v3, %v927_v2 }
 0x260   :  { %931 = vadd.xlane.f32.xlu1 %v930_v5 }
 0x271   :  { %953 = vperm.xlu1 %1953, %v950_v6  }
 0x2ed   :  { %v932_v12 = vpop.xlane.xlu1 %931 }
 0x2ee   :  { %v933_v13 = vmul.f32 0.001953125, %v932_v12  ;;  %v1018_v12 = vld [vmem:[#allocation3 + $0x1] ss:$8 sm:$0xf] }
 0x2f0   :  { %v934_v14 = vadd.f32 1e-05, %v933_v13  ;;  %v1192_v13 = vld [vmem:[#allocation8 + $0x8] sm:$0xff] }
 0x2f1   :  { %v954_v19 = vpop.permute.xlu1 %953 }
 0x2f2   :  { %1954 = vrsqrt.f32 %v934_v14 }
 0x2fc   :  { %v1955_v15 = vpop.eup %1954 }
 0x2fd   :  { %v936_v17 = vmul.f32 %v1955_v15, %v920_v58  ;;  %v937_v18 = vmul.f32 %v1955_v15, %v921_v59  ;;  %v939_v20 = vmul.f32 %v1955_v15, %v923_v61  ;;  %v938_v24 = vmul.f32 %v1955_v15, %v922_v60  ;;  %v1161_v58 = vld [vmem:[#allocation3 + $0x5] ss:$8 sm:$0xf]  ;;  %v976_v15 = vld [vmem:[#allocation3] ss:$8 sm:$0xf] }
 0x2fe   :  { %v1170_v62 = vrot.slane %v1161_v58, %v2251_v9  ;;  %v1166_v63 = vrot.slane %v1161_v58, %v2249_v8 }
 0x2ff   :  { %v946_v21 = vmul.f32 %v944_v16, %v936_v17  ;;  %v947_v22 = vmul.f32 %v944_v16, %v937_v18  ;;  %v949_v25 = vmul.f32 %v944_v16, %v939_v20  ;;  %v948_v28 = vmul.f32 %v944_v16, %v938_v24 }
 0x300   :  { %v985_v16 = vrot.slane %v976_v15, %v2251_v9  ;;  %v1027_v17 = vrot.slane %v1018_v12, %v2251_v9 }
 0x301   :  { %v956_v23 = vadd.f32 %v954_v19, %v946_v21  ;;  %v957_v26 = vadd.f32 %v954_v19, %v947_v22  ;;  %v959_v29 = vadd.f32 %v954_v19, %v949_v25  ;;  %v958_v31 = vadd.f32 %v954_v19, %v948_v28 }
 0x302   :  { %v981_v25 = vrot.slane %v976_v15, %v2249_v8 }
 0x303   :  { %v2395_v27 = vmax.f32 %v956_v23, 0.0  ;;  %v961_v30 = vmax.f32 %v957_v26, 0.0  ;;  %v963_v32 = vmax.f32 %v959_v29, 0.0  ;;  %v962_v33 = vmax.f32 %v958_v31, 0.0 }
 0x304   :  { %v1023_v23 = vrot.slane %v1018_v12, %v2249_v8 }
 0x305   :  { %1149 = vrot.lane.b32.xlu0 %v2395_v27, %s2064_s2  ;;  %1103 = vrot.lane.b32.xlu1 %v2395_v27, %s2063_s27 }
 0x309   :  { %966 = vrot.lane.b32.xlu0 %v961_v30, %s2065_s28  ;;  %1105 = vrot.lane.b32.xlu1 %v961_v30, %s2063_s27 }
 0x30d   :  { %1008 = vrot.lane.b32.xlu0 %v961_v30, %s2066_s30  ;;  %1109 = vrot.lane.b32.xlu1 %v963_v32, %s2063_s27 }
 0x311   :  { %1012 = vrot.lane.b32.xlu0 %v963_v32, %s2066_s30  ;;  %1107 = vrot.lane.b32.xlu1 %v962_v33, %s2063_s27 }
 0x315   :  { %968 = vrot.lane.b32.xlu0 %v962_v33, %s2065_s28  ;;  %1151 = vrot.lane.b32.xlu1 %v961_v30, %s2064_s2 }
 0x319   :  { %1048 = vrot.lane.b32.xlu0 %v2395_v27, %s2068_s9  ;;  %1153 = vrot.lane.b32.xlu1 %v962_v33, %s2064_s2 }
 0x31d   :  { %1054 = vrot.lane.b32.xlu0 %v963_v32, %s2068_s9  ;;  %964 = vrot.lane.b32.xlu1 %v2395_v27, %s2065_s28 }
 0x321   :  { %1499 = vrot.lane.b32.xlu0 %v962_v33, %s2069_s10  ;;  %1006 = vrot.lane.b32.xlu1 %v2395_v27, %s2066_s30 }
 0x325   :  { %1541 = vrot.lane.b32.xlu0 %v962_v33, %s2070_s11  ;;  %970 = vrot.lane.b32.xlu1 %v963_v32, %s2065_s28 }
 0x329   :  { %1495 = vrot.lane.b32.xlu0 %v2395_v27, %s2069_s10  ;;  %1155 = vrot.lane.b32.xlu1 %v963_v32, %s2064_s2 }
 0x32d   :  { %1501 = vrot.lane.b32.xlu0 %v963_v32, %s2069_s10  ;;  %1010 = vrot.lane.b32.xlu1 %v962_v33, %s2066_s30 }
 0x331   :  { %1581 = vrot.lane.b32.xlu0 %v961_v30, %s2071_s12  ;;  %1050 = vrot.lane.b32.xlu1 %v961_v30, %s2068_s9 }
 0x335   :  { %1579 = vrot.lane.b32.xlu0 %v2395_v27, %s2071_s12  ;;  %1497 = vrot.lane.b32.xlu1 %v961_v30, %s2069_s10 }
 0x339   :  { %1539 = vrot.lane.b32.xlu1 %v961_v30, %s2070_s11 }
 0x33d   :  { %1052 = vrot.lane.b32.xlu1 %v962_v33, %s2068_s9 }
 0x341   :  { %1537 = vrot.lane.b32.xlu1 %v2395_v27, %s2070_s11 }
 0x345   :  { %1543 = vrot.lane.b32.xlu1 %v963_v32, %s2070_s11 }
 0x349   :  { %1583 = vrot.lane.b32.xlu1 %v962_v33, %s2071_s12 }
 0x34d   :  { %1585 = vrot.lane.b32.xlu1 %v963_v32, %s2071_s12 }
 0x377   :  { %v2437_v35 = vpop.permute.xlu0 %1149  ;;  %v1104_v36 = vpop.permute.xlu1 %1103 }
 0x37b   :  { %v2440_v38 = vpop.permute.xlu0 %966  ;;  %v1106_v39 = vpop.permute.xlu1 %1105 }
 0x37c   :  { %v1113_v40 = vsel %vm229_vm0, %v1104_v36, %v1106_v39 }
 0x37d   :  { %v1138_v41 = vmul.f32 %v1124_v37, %v1113_v40  ;;  %v993_v40 = vrot.slane %v976_v15, %v2255_v11 }
 0x37f   :  { %v2445_v43 = vpop.permute.xlu0 %1008  ;;  %v1110_v44 = vpop.permute.xlu1 %1109  ;;  %v1894_v45 = vpack.c.bf16 %v961_v30, %v1138_v41 }
 0x380   :  { %v1114_v46 = vsel %vm229_vm0, %v1110_v44, %v1104_v36 }
 0x381   :  { %v1137_v47 = vmul.f32 %v1120_v42, %v1114_v46  ;;  %1895 = vmatprep.subr.bf16.mxu0 %v1894_v45  ;;  %v1031_v46 = vrot.slane %v1018_v12, %v2253_v10 }
 0x383   :  { %v1896_v50 = vpack.c.bf16 %v2395_v27, %v1137_v47  ;;  %v2452_v51 = vpop.permute.xlu0 %1012  ;;  %v1108_v52 = vpop.permute.xlu1 %1107  ;;  %v1035_v47 = vrot.slane %v1018_v12, %v2255_v11  ;;  %v1507_v12 = vld [vmem:[#allocation3 + $0x6] ss:$8 sm:$0xf] }
 0x384   :  { %v1111_v53 = vsel %vm229_vm0, %v1108_v52, %v1110_v44  ;;  %v1112_v54 = vsel %vm229_vm0, %v1106_v39, %v1108_v52  ;;  %v989_v39 = vrot.slane %v976_v15, %v2253_v10 }
 0x385   :  { %v1139_v55 = vmul.f32 %v1128_v48, %v1112_v54  ;;  %v1140_v56 = vmul.f32 %v1132_v49, %v1111_v53  ;;  %1897 = vmatpush1.bf16.msra.mxu0 %v1896_v50  ;;  %v1060_v50 = vld [vmem:[#allocation3 + $0x2] ss:$8 sm:$0xf] }
 0x387   :  { %v1900_v57 = vpack.c.bf16 %v962_v33, %v1139_v55  ;;  %v1152_v59 = vpop.permute.xlu1 %1151  ;;  %v1898_v60 = vpack.c.bf16 %v963_v32, %v1140_v56  ;;  %v969_v61 = vpop.permute.xlu0 %968  ;;  %v1174_v32 = vrot.slane %v1161_v58, %v2253_v10  ;;  %v1178_v33 = vrot.slane %v1161_v58, %v2255_v11 }
 0x388   :  { %v1159_v0 = vsel %vm277_vm1, %v2437_v35, %v1152_v59  ;;  %v973_v48 = vsel %vm85_vm3, %v2440_v38, %v969_v61  ;;  %v1069_v55 = vrot.slane %v1060_v50, %v2251_v9 }
 0x389   :  { %1899 = vmatprep.subr.bf16.mxu1 %v1898_v60  ;;  %v1183_v5 = vmul.f32 %v1166_v63, %v1159_v0 }
 0x38a   :  { %1901 = vmatpush1.bf16.msra.mxu1 %v1900_v57 }
 0x38b   :  { %v1154_v1 = vpop.permute.xlu1 %1153  ;;  %v1049_v6 = vpop.permute.xlu0 %1048 }
 0x38c   :  { %v1158_v2 = vsel %vm277_vm1, %v1152_v59, %v1154_v1  ;;  %v1065_v59 = vrot.slane %v1060_v50, %v2249_v8 }
 0x38d   :  { %v1184_v3 = vmul.f32 %v1170_v62, %v1158_v2  ;;  %v1549_v2 = vld [vmem:[#allocation3 + $0x7] ss:$8 sm:$0xf] }
 0x38f   :  { %1212 = vmatprep.subr.mxu0 %v1184_v3  ;;  %v965_v14 = vpop.permute.xlu1 %964  ;;  %v2472_v20 = vpop.permute.xlu0 %1054  ;;  %v1090_v3 = vld [vmem:[#allocation8] sm:$0xff] }
 0x390   :  { %1213 = vmatpush1.msra.mxu0 %v1183_v5  ;;  %v974_v18 = vsel %vm85_vm3, %v965_v14, %v2440_v38  ;;  %v1000_v38 = vmul.f32 %v989_v39, %v973_v48 }
 0x391   :  { %1864 = vmatmul.mubr.msk.f32.vlgmr.msra.gmra.mrb[2].mxu0 %vm327_vm2, %v1192_v13  ;;  %v999_v22 = vmul.f32 %v985_v16, %v974_v18 }
 0x392   :  { %1417 = vmatprep.mubr.f32.mxu0 %v2067_v4 }
 0x393   :  { %v1007_v19 = vpop.permute.xlu1 %1006  ;;  %v2486_v34 = vpop.permute.xlu0 %1499 }
 0x394   :  { %v1016_v21 = vsel %vm128_vm4, %v1007_v19, %v2445_v43  ;;  %v1017_v26 = vsel %vm128_vm4, %v2452_v51, %v1007_v19 }
 0x395   :  { %v1041_v24 = vmul.f32 %v1027_v17, %v1016_v21  ;;  %v1040_v30 = vmul.f32 %v1023_v23, %v1017_v26  ;;  %v1073_v21 = vrot.slane %v1060_v50, %v2253_v10 }
 0x397   :  { %v971_v27 = vpop.permute.xlu1 %970  ;;  %v1902_v28 = vpack.c.bf16 %v1041_v24, %v999_v22  ;;  %v2502_v53 = vpop.permute.xlu0 %1541  ;;  %v1077_v22 = vrot.slane %v1060_v50, %v2255_v11 }
 0x398   :  { %v975_v29 = vsel %vm85_vm3, %v971_v27, %v965_v14  ;;  %v972_v49 = vsel %vm85_vm3, %v969_v61, %v971_v27  ;;  %v1558_v14 = vrot.slane %v1549_v2, %v2251_v9  ;;  %v1512_v27 = vrot.slane %v1507_v12, %v2249_v8 }
 0x399   :  { %v998_v31 = vmul.f32 %v981_v25, %v975_v29  ;;  %1903 = vmatprep.subr.bf16.mxu0 %v1902_v28  ;;  %v1001_v56 = vmul.f32 %v993_v40, %v972_v49 }
 0x39b   :  { %v1904_v36 = vpack.c.bf16 %v1040_v30, %v998_v31  ;;  %v1156_v37 = vpop.permute.xlu1 %1155  ;;  %v1554_v30 = vrot.slane %v1549_v2, %v2249_v8 }
 0x39c   :  { %v1157_v41 = vsel %vm277_vm1, %v1154_v1, %v1156_v37  ;;  %v1160_v42 = vsel %vm277_vm1, %v1156_v37, %v2437_v35  ;;  %v1496_v1 = vpop.permute.xlu0 %1495 }
 0x39d   :  { %v1185_v44 = vmul.f32 %v1174_v32, %v1157_v41  ;;  %v1186_v45 = vmul.f32 %v1178_v33, %v1160_v42  ;;  %1905 = vmatpush1.bf16.msra.mxu0 %v1904_v36  ;;  %v1520_v36 = vrot.slane %v1507_v12, %v2253_v10  ;;  %v1562_v41 = vrot.slane %v1549_v2, %v2253_v10 }
 0x39e   :  { %v1566_v42 = vrot.slane %v1549_v2, %v2255_v11 }
 0x39f   :  { %1283 = vmatprep.subr.mxu1 %v1186_v45  ;;  %v1011_v52 = vpop.permute.xlu1 %1010 }
 0x3a0   :  { %v1014_v35 = vsel %vm128_vm4, %v1011_v52, %v2452_v51  ;;  %v1015_v54 = vsel %vm128_vm4, %v2445_v43, %v1011_v52  ;;  %1284 = vmatpush1.msra.mxu1 %v1185_v44  ;;  %v1059_v51 = vsel %vm172_vm5, %v2472_v20, %v1049_v6  ;;  %v1502_v16 = vpop.permute.xlu0 %1501 }
 0x3a1   :  { %v1042_v57 = vmul.f32 %v1031_v46, %v1015_v54  ;;  %v1043_v58 = vmul.f32 %v1035_v47, %v1014_v35  ;;  %1865 = vmatmul.mubr.msk.f32.vlgmr.msra.gmra.mrb[2].mxu1 %vm327_vm2, %v1192_v13  ;;  %v1082_v0 = vmul.f32 %v1065_v59, %v1059_v51  ;;  %v1516_v13 = vrot.slane %v1507_v12, %v2251_v9  ;;  %v1591_v46 = vld [vmem:[#allocation3 + $0x20] ss:$8 sm:$0xf] }
 0x3a2   :  { %1488 = vmatprep.mubr.f32.mxu1 %v2067_v4  ;;  %v1503_v44 = vsel %vm626_vm6, %v2486_v34, %v1502_v16  ;;  %v1506_v45 = vsel %vm626_vm6, %v1502_v16, %v1496_v1  ;;  %v1600_v35 = vrot.slane %v1591_v46, %v2251_v9  ;;  %v1604_v9 = vrot.slane %v1591_v46, %v2253_v10 }
 0x3a3   :  { %v1908_v60 = vpack.c.bf16 %v1042_v57, %v1000_v38  ;;  %v1051_v61 = vpop.permute.xlu1 %1050  ;;  %v1906_v43 = vpack.c.bf16 %v1043_v58, %v1001_v56  ;;  %v1531_v54 = vmul.f32 %v1520_v36, %v1503_v44 }
 0x3a4   :  { %v1058_v62 = vsel %vm172_vm5, %v1049_v6, %v1051_v61  ;;  %v1582_v31 = vpop.permute.xlu0 %1581 }
 0x3a5   :  { %v1083_v63 = vmul.f32 %v1069_v55, %v1058_v62  ;;  %1907 = vmatprep.subr.bf16.mxu1 %v1906_v43  ;;  %v1622_v43 = vld [vmem:[#allocation8 + $0x10] sm:$0xff] }
 0x3a6   :  { %1909 = vmatpush1.bf16.msra.mxu1 %v1908_v60  ;;  %v1608_v60 = vrot.slane %v1591_v46, %v2255_v11 }
 0x3a7   :  { %1357 = vmatprep.subr.mxu0 %v1083_v63  ;;  %v1498_v5 = vpop.permute.xlu1 %1497 }
 0x3a8   :  { %1358 = vmatpush1.msra.mxu0 %v1082_v0  ;;  %v1504_v6 = vsel %vm626_vm6, %v1498_v5, %v2486_v34  ;;  %v1505_v32 = vsel %vm626_vm6, %v1496_v1, %v1498_v5  ;;  %v1580_v49 = vpop.permute.xlu0 %1579 }
 0x3a9   :  { %1866 = vmatmul.mubr.msk.f32.vlgmr.msra.gmra.mrb[2].mxu0 %vm327_vm2, %v1090_v3  ;;  %v1530_v18 = vmul.f32 %v1516_v13, %v1504_v6  ;;  %v1529_v39 = vmul.f32 %v1512_v27, %v1505_v32  ;;  %v1589_v56 = vsel %vm714_vm8, %v1580_v49, %v1582_v31  ;;  %v1820_v27 = vld [vmem:[%s2609_s7] sm:$0xff]  ;;  %s1848_s7 = sshll.u32 %s2073_s6, 4  ;;  %s1849_s7 = int_to_ptr.vmem [resolvable:$true] %s1848_s7 }
 0x3aa   :  { %1702 = vmatprep.mubr.f32.mxu0 %v2067_v4  ;;  %s2028_s5 = scalar_lea.vmem %s1849_s7, 512  ;;  %p2033_p11 = scmp.lt.s32.totalorder %s1849_s7, %s1849_s7 }
 0x3ab   :  { %v1540_v15 = vpop.permute.xlu1 %1539  ;;  %p2029_p10 = scmp.ne.s32.totalorder %s1849_s7, %s2028_s5  ;;  %p2034_p12 = scmp.lt.s32.totalorder %s2028_s5, %s2028_s5 }
 0x3ac   :  { %v1546_v17 = vsel %vm670_vm7, %v1540_v15, %v2502_v53 }
 0x3ad   :  { %v1572_v19 = vmul.f32 %v1558_v14, %v1546_v17  ;;  %p2035_p13 = por %p2034_p12, %p2033_p11 }
 0x3af   :  { %v1053_v23 = vpop.permute.xlu1 %1052  ;;  %v1910_v24 = vpack.c.bf16 %v1572_v19, %v1530_v18  ;;  %p2036_p0 = pnand %p2035_p13, %p2029_p10 }
 0x3b0   :  { %v1056_v25 = vsel %vm172_vm5, %v1053_v23, %v2472_v20  ;;  %v1057_v26 = vsel %vm172_vm5, %v1051_v61, %v1053_v23  ;;  %v1524_v20 = vrot.slane %v1507_v12, %v2255_v11 }
 0x3b1   :  { %v1084_v28 = vmul.f32 %v1073_v21, %v1057_v26  ;;  %v1085_v29 = vmul.f32 %v1077_v22, %v1056_v25  ;;  %1911 = vmatprep.subr.bf16.mxu0 %v1910_v24 }
 0x3b2   :  { %v1532_v34 = vmul.f32 %v1524_v20, %v1506_v45 }
 0x3b3   :  { %1428 = vmatprep.subr.mxu1 %v1085_v29  ;;  %v1538_v33 = vpop.permute.xlu1 %1537 }
 0x3b4   :  { %v1547_v37 = vsel %vm670_vm7, %v1538_v33, %v1540_v15  ;;  %1429 = vmatpush1.msra.mxu1 %v1084_v28 }
 0x3b5   :  { %v1571_v40 = vmul.f32 %v1554_v30, %v1547_v37  ;;  %1867 = vmatmul.mubr.msk.f32.vlgmr.msra.gmra.mrb[2].mxu1 %vm327_vm2, %v1090_v3 }
 0x3b6   :  { %1773 = vmatprep.mubr.f32.mxu1 %v2067_v4  ;;  %v1596_v4 = vrot.slane %v1591_v46, %v2249_v8 }
 0x3b7   :  { %v1912_v47 = vpack.c.bf16 %v1571_v40, %v1529_v39  ;;  %v1544_v48 = vpop.permute.xlu1 %1543 }
 0x3b8   :  { %v1545_v50 = vsel %vm670_vm7, %v2502_v53, %v1544_v48  ;;  %v1548_v52 = vsel %vm670_vm7, %v1544_v48, %v1538_v33  ;;  %v1613_v61 = vmul.f32 %v1596_v4, %v1589_v56 }
 0x3b9   :  { %v1573_v55 = vmul.f32 %v1562_v41, %v1545_v50  ;;  %v1574_v38 = vmul.f32 %v1566_v42, %v1548_v52  ;;  %1913 = vmatpush1.bf16.msra.mxu0 %v1912_v47  ;;  %v1959_v52 = vld [vmem:[%s2602_s0 + $0x8] sm:$0xff] }
 0x3bb   :  { %v1916_v57 = vpack.c.bf16 %v1573_v55, %v1531_v54  ;;  %v1584_v58 = vpop.permute.xlu1 %1583  ;;  %v1914_v59 = vpack.c.bf16 %v1574_v38, %v1532_v34  ;;  %v1960_v54 = vld [vmem:[%s2602_s0 + $0x10] sm:$0xff]  ;;  %v1961_v55 = vld [vmem:[%s2602_s0 + $0x18] sm:$0xff] }
 0x3bc   :  { %v1588_v53 = vsel %vm714_vm8, %v1582_v31, %v1584_v58 }
 0x3bd   :  { %v1614_v51 = vmul.f32 %v1600_v35, %v1588_v53  ;;  %1915 = vmatprep.subr.bf16.mxu1 %v1914_v59 }
 0x3be   :  { %1917 = vmatpush1.bf16.msra.mxu1 %v1916_v57 }
 0x3bf   :  { %1642 = vmatprep.subr.mxu0 %v1614_v51  ;;  %v1586_v8 = vpop.permute.xlu1 %1585 }
 0x3c0   :  { %v1587_v62 = vsel %vm714_vm8, %v1584_v58, %v1586_v8  ;;  %v1590_v63 = vsel %vm714_vm8, %v1586_v8, %v1580_v49  ;;  %1643 = vmatpush1.msra.mxu0 %v1613_v61  ;;  %v1958_v49 = vld [vmem:[%s2602_s0] sm:$0xff] }
 0x3c1   :  { %v1615_v0 = vmul.f32 %v1604_v9, %v1587_v62  ;;  %v1616_v1 = vmul.f32 %v1608_v60, %v1590_v63  ;;  %1868 = vmatmul.mubr.msk.f32.vlgmr.msra.gmra.mrb[2].mxu0 %vm327_vm2, %v1622_v43 }
 0x3c3   :  { %1713 = vmatprep.subr.mxu1 %v1616_v1 }
 0x3c4   :  { %1714 = vmatpush1.msra.mxu1 %v1615_v0 }
 0x3c5   :  { %1869 = vmatmul.mubr.msk.f32.vlgmr.msra.gmra.mrb[2].mxu1 %vm327_vm2, %v1622_v43 }
 0x494   :  { %v1704_v10 = vpop.f32.mrb[2].mxu0 }
 0x495   :  { %v1706_v11 = vpop.f32.mrb[3].mxu0 }
 0x496   :  { %v1784_v2 = vadd.f32 %v1706_v11, %v1704_v10 }
 0x498   :  { %v1775_v3 = vpop.f32.mrb[2].mxu1 }
 0x499   :  { %v1785_v5 = vadd.f32 %v1784_v2, %v1775_v3  ;;  %v1777_v12 = vpop.f32.mrb[3].mxu1 }
 0x49b   :  { %v1786_v13 = vadd.f32 %v1785_v5, %v1777_v12 }
 0x49d   :  { %1787 = vadd.xlane.f32.xlu0 %v1786_v13 }
 0x4b3   :  { %1813 = vperm.xlu0 %1952, %v1810_v7  }
 0x52a   :  { %v1788_v14 = vpop.xlane.xlu0 %1787 }
 0x52b   :  { %v1789_v6 = vmul.f32 0.001953125, %v1788_v14 }
 0x52d   :  { %v1790_v15 = vsub.f32 %v1704_v10, %v1789_v6  ;;  %v1791_v16 = vsub.f32 %v1706_v11, %v1789_v6  ;;  %v1792_v17 = vsub.f32 %v1775_v3, %v1789_v6  ;;  %v1793_v18 = vsub.f32 %v1777_v12, %v1789_v6 }
 0x52f   :  { %v1794_v19 = vmul.f32 %v1790_v15, %v1790_v15  ;;  %v1795_v21 = vmul.f32 %v1791_v16, %v1791_v16  ;;  %v1796_v22 = vmul.f32 %v1792_v17, %v1792_v17  ;;  %v1797_v24 = vmul.f32 %v1793_v18, %v1793_v18 }
 0x531   :  { %v1798_v23 = vadd.f32 %v1795_v21, %v1794_v19 }
 0x532   :  { %v1814_v37 = vpop.permute.xlu0 %1813 }
 0x533   :  { %v1799_v25 = vadd.f32 %v1798_v23, %v1796_v22 }
 0x535   :  { %v1800_v26 = vadd.f32 %v1799_v25, %v1797_v24 }
 0x537   :  { %1801 = vadd.xlane.f32.xlu1 %v1800_v26 }
 0x548   :  { %1823 = vperm.xlu1 %1953, %v1820_v27  }
 0x5c4   :  { %v1802_v28 = vpop.xlane.xlu1 %1801 }
 0x5c5   :  { %v1803_v29 = vmul.f32 0.001953125, %v1802_v28 }
 0x5c7   :  { %v1804_v30 = vadd.f32 1e-05, %v1803_v29 }
 0x5c8   :  { %v1824_v44 = vpop.permute.xlu1 %1823 }
 0x5c9   :  { %1956 = vrsqrt.f32 %v1804_v30 }
 0x5d3   :  { %v1957_v31 = vpop.eup %1956 }
 0x5d4   :  { %v1806_v32 = vmul.f32 %v1957_v31, %v1790_v15  ;;  %v1807_v33 = vmul.f32 %v1957_v31, %v1791_v16  ;;  %v1808_v36 = vmul.f32 %v1957_v31, %v1792_v17  ;;  %v1809_v20 = vmul.f32 %v1957_v31, %v1793_v18 }
 0x5d6   :  { %v1816_v39 = vmul.f32 %v1814_v37, %v1806_v32  ;;  %v1817_v40 = vmul.f32 %v1814_v37, %v1807_v33  ;;  %v1818_v41 = vmul.f32 %v1814_v37, %v1808_v36  ;;  %v1819_v42 = vmul.f32 %v1814_v37, %v1809_v20 }
 0x5d8   :  { %v1826_v45 = vadd.f32 %v1824_v44, %v1816_v39  ;;  %v1827_v46 = vadd.f32 %v1824_v44, %v1817_v40  ;;  %v1828_v47 = vadd.f32 %v1824_v44, %v1818_v41  ;;  %v1829_v48 = vadd.f32 %v1824_v44, %v1819_v42 }
 0x5da   :  { %v1830_v50 = vadd.f32 %v1958_v49, %v1826_v45  ;;  %v1831_v35 = vadd.f32 %v1959_v52, %v1827_v46  ;;  %v1832_v34 = vadd.f32 %v1960_v54, %v1828_v47  ;;  %v1833_v38 = vadd.f32 %v1961_v55, %v1829_v48 }
 0x5dc   :  { %v1834_v4 = vmax.f32 %v1830_v50, 0.0  ;;  %v1835_v56 = vmax.f32 %v1831_v35, 0.0  ;;  %v1836_v57 = vmax.f32 %v1832_v34, 0.0  ;;  %v1837_v58 = vmax.f32 %v1833_v38, 0.0 }
 0x5de   :  { %1838 = vst [vmem:[#allocation9] sm:$0xff] %v1834_v4  ;;  %1839 = vst [vmem:[#allocation9 + $0x8] sm:$0xff] %v1835_v56 }
 0x5df   :  { %1840 = vst [vmem:[#allocation9 + $0x10] sm:$0xff] %v1836_v57  ;;  %1841 = vst [vmem:[#allocation9 + $0x18] sm:$0xff] %v1837_v58 }
 0x5e0   :  { %2039 = shalt.err (!%p2036_p0)
}
 0x5e1   :  { %s2040_s0 = scalar_lea.hbm %s2610_s8, 512 }
 0x5e2   :  { %p2041_p1 = scmp.ne.s32.totalorder %s2610_s8, %s2040_s0  ;;  %p2044_p2 = scmp.lt.u32.totalorder %s2040_s0, %s2610_s8 }
 0x5e4   :  { %p2046_p3 = pnand %p2044_p2, %p2041_p1 }
 0x5e6   :  { %2049 = shalt.err (!%p2046_p3)
}
 0x5e7   :  { %1851 = dma.vmem_to_hbm [thread:$0]  %s1849_s7, 512, %s2610_s8, [#allocation5]  }
 0x5e8   :  { %2054 = dma.done.wait [#allocation5], 512  }
 0x5e9   :  { %2055 = vsyncadd [#allocation5], 4294966784 }
 0x5ea   :  { %1855 = vsyncpa [#allocation4], 1 }
 0x5eb   :  { %1856 = vsyncpa [#allocation7], 1 }
 0x5ec   :  { %1857 = vsyncpa [#allocation5], 1 }

</bundles_post_ra>
